<compile_context>
chip_gen: v7x
topology: tpu7x:2x2x1
jax: 0.10.0
libtpu: 0.0.40
codegen_flags: <defaults>
</compile_context>

<pallas_src>
import jax
import jax.numpy as jnp
from jax.experimental import pallas as pl
from jax.experimental.pallas import tpu as pltpu


HIDDEN = 64
_PACKED = 2 * HIDDEN          # 128 lanes: both Q heads side by side
_TB_CAP = 2048                # max rows per grid step (VMEM stays in the MBs)


def _round_up(x, m):
    return ((x + m - 1) // m) * m


def _critic_kernel(x_ref, w1_ref, b1_ref, w2_ref, b2_ref, w3_ref, b3_ref, q_ref):
    # Layer 1: fused [states|actions] input (zero-padded K). bf16 MXU, f32 acc.
    x = x_ref[...].astype(jnp.bfloat16)
    h = jnp.dot(x, w1_ref[...], preferred_element_type=jnp.float32) + b1_ref[...]
    h = jnp.maximum(h, 0.0)

    # Layer 2: block-diagonal (128,128) keeps the two heads independent.
    h = jnp.dot(h.astype(jnp.bfloat16), w2_ref[...],
                preferred_element_type=jnp.float32) + b2_ref[...]
    h = jnp.maximum(h, 0.0)

    # Layer 3: lane-dense (128,128) f32 output; q1 in lane 0, q2 in lane 64,
    # all other lanes are exact zeros -> full-lane unmasked stores.
    q_ref[...] = jnp.dot(h, w3_ref[...],
                         preferred_element_type=jnp.float32) + b3_ref[...]


def _target_grid_steps():
    """2 grid steps on v7x (2 TensorCores/chip); 1 on single-TC chips."""
    try:
        kind = jax.devices()[0].device_kind.lower()
    except Exception:
        kind = ""
    return 2 if ("v7" in kind or "7x" in kind) else 1


@jax.jit
def critic_forward(states, actions, packed):
    """states: (B, in_channels), actions: (B, action_size). Returns (q1, q2)."""
    B = states.shape[0]
    D = states.shape[1] + actions.shape[1]
    K_pad = packed["w1"].shape[0]

    # One grid step on v5e/v6e (single TC); two parallel steps on v7x.  Cap the
    # tile at 2048 rows so very large batches never stress scoped VMEM.
    steps = _target_grid_steps()
    tb = min(_TB_CAP, max(16, _round_up(-(-B // steps), 16)))
    B_pad = pl.cdiv(B, tb) * tb

    # Single concat + single zero-pad (no scatter) feeding the fused layer 1.
    x = jnp.concatenate([states.astype(jnp.float32),
                         actions.astype(jnp.float32)], axis=1)
    x = jnp.pad(x, ((0, B_pad - B), (0, K_pad - D)))

    flops = 2 * B_pad * (K_pad * _PACKED + _PACKED * _PACKED + _PACKED * _PACKED)
    bytes_accessed = (
        x.size * 4                                              # activations in
        + (packed["w1"].size + packed["w2"].size) * 2           # bf16 weights
        + packed["w3"].size * 4                                 # f32 final weight
        + (packed["b1"].size + packed["b2"].size
           + packed["b3"].size) * 4                             # f32 biases
        + B_pad * _PACKED * 4                                   # 128-lane output
    )

    const = lambda i: (0, 0)   # weights/biases: same block every grid step

    q = pl.pallas_call(
        _critic_kernel,
        out_shape=jax.ShapeDtypeStruct((B_pad, _PACKED), jnp.float32),
        grid_spec=pltpu.PrefetchScalarGridSpec(
            num_scalar_prefetch=0,
            grid=(B_pad // tb,),
            in_specs=[
                pl.BlockSpec((tb, K_pad), lambda i: (i, 0)),      # x tile
                pl.BlockSpec((K_pad, _PACKED), const),            # W1 fused
                pl.BlockSpec((1, _PACKED), const),                # b1
                pl.BlockSpec((_PACKED, _PACKED), const),          # W2 block-diag
                pl.BlockSpec((1, _PACKED), const),                # b2
                pl.BlockSpec((_PACKED, _PACKED), const),          # W3 lane-dense
                pl.BlockSpec((1, _PACKED), const),                # b3
            ],
            out_specs=pl.BlockSpec((tb, _PACKED), lambda i: (i, 0)),
        ),
        compiler_params=pltpu.CompilerParams(
            dimension_semantics=("parallel",)),
        cost_estimate=pl.CostEstimate(
            flops=flops, transcendentals=0, bytes_accessed=bytes_accessed),
    )(x, packed["w1"], packed["b1"], packed["w2"], packed["b2"],
      packed["w3"], packed["b3"])

    # q1 lives in lane 0, q2 in lane 64; padded rows/lanes are dropped here.
    return q[:B, 0:1], q[:B, HIDDEN:HIDDEN + 1]


def init_critic_params(key, in_channels, action_size):
    """PyTorch-style uniform(-1/sqrt(fan_in), 1/sqrt(fan_in)) init (unpacked, f32)."""
    D = in_channels + action_size

    def linear(key, fan_in, fan_out):
        kw, kb = jax.random.split(key)
        bound = 1.0 / float(fan_in) ** 0.5
        # stored as (in, out) so forward is x @ W
        w = jax.random.uniform(kw, (fan_in, fan_out), jnp.float32, -bound, bound)
        b = jax.random.uniform(kb, (1, fan_out), jnp.float32, -bound, bound)
        return w, b

    keys = jax.random.split(key, 6)
    w1a, b1a = linear(keys[0], D, HIDDEN)
    w2a, b2a = linear(keys[1], HIDDEN, HIDDEN)
    w3a, b3a = linear(keys[2], HIDDEN, 1)
    w1b, b1b = linear(keys[3], D, HIDDEN)
    w2b, b2b = linear(keys[4], HIDDEN, HIDDEN)
    w3b, b3b = linear(keys[5], HIDDEN, 1)
    return dict(w1a=w1a, b1a=b1a, w2a=w2a, b2a=b2a, w3a=w3a, b3a=b3a,
                w1b=w1b, b1b=b1b, w2b=w2b, b2b=b2b, w3b=w3b, b3b=b3b)


def pack_critic_params(params, in_channels, action_size):
    """One-time packing of the twin heads into a fused 128-lane matmul chain."""
    D = in_channels + action_size
    K_pad = max(16, _round_up(D, 16))

    # W1: concat heads along the output axis -> (D, 128); zero-pad input rows.
    w1 = jnp.concatenate([params["w1a"], params["w1b"]], axis=1)
    w1 = jnp.pad(w1, ((0, K_pad - D), (0, 0)))
    b1 = jnp.concatenate([params["b1a"], params["b1b"]], axis=1)       # (1, 128)

    # W2: block-diagonal (off-diagonal blocks are exact zeros).
    w2 = jnp.zeros((_PACKED, _PACKED), jnp.float32)
    w2 = w2.at[:HIDDEN, :HIDDEN].set(params["w2a"])
    w2 = w2.at[HIDDEN:, HIDDEN:].set(params["w2b"])
    b2 = jnp.concatenate([params["b2a"], params["b2b"]], axis=1)       # (1, 128)

    # W3: lane-dense (128, 128); only lane 0 (q1) and lane 64 (q2) are non-zero.
    w3 = jnp.zeros((_PACKED, _PACKED), jnp.float32)
    w3 = w3.at[:HIDDEN, 0:1].set(params["w3a"])
    w3 = w3.at[HIDDEN:, HIDDEN:HIDDEN + 1].set(params["w3b"])
    b3 = jnp.zeros((1, _PACKED), jnp.float32)
    b3 = b3.at[:, 0:1].set(params["b3a"])
    b3 = b3.at[:, HIDDEN:HIDDEN + 1].set(params["b3b"])

    return dict(
        w1=w1.astype(jnp.bfloat16), b1=b1.astype(jnp.float32),
        w2=w2.astype(jnp.bfloat16), b2=b2.astype(jnp.float32),
        w3=w3.astype(jnp.float32), b3=b3.astype(jnp.float32),   # final layer f32
    )


def critic_reference(states, actions, params):
    """Pure-JAX f32 reference mirroring the PyTorch forward (unpacked params)."""
    x = jnp.concatenate([states, actions], axis=1)

    def mlp(p):
        h = jnp.maximum(x @ params["w1" + p] + params["b1" + p], 0.0)
        h = jnp.maximum(h @ params["w2" + p] + params["b2" + p], 0.0)
        return h @ params["w3" + p] + params["b3" + p]

    return mlp("a"), mlp("b")


if __name__ == "__main__":
    key = jax.random.PRNGKey(0)
    k_params, k_states, k_actions = jax.random.split(key, 3)

    batch = 4
    in_channels = 4    # cartpole observation dim
    action_size = 2

    params = init_critic_params(k_params, in_channels, action_size)
    packed = pack_critic_params(params, in_channels, action_size)

    states = jax.random.normal(k_states, (batch, in_channels), jnp.float32)
    actions = jax.random.normal(k_actions, (batch, action_size), jnp.float32)

    q1, q2 = critic_forward(states, actions, packed)
    q1, q2 = jax.block_until_ready((q1, q2))

    q1_ref, q2_ref = critic_reference(states, actions, params)
    assert q1.shape == (batch, 1) and q2.shape == (batch, 1)
    # bf16 MXU inputs for layers 1-2 with f32 accumulation, f32 final layer.
    assert jnp.allclose(q1, q1_ref, atol=5e-2, rtol=5e-2)
    assert jnp.allclose(q2, q2_ref, atol=5e-2, rtol=5e-2)

    print("KERNEL_OK")
</pallas_src>

<mosaic_0001>
module attributes {stable_mosaic.version = 11 : i64} {
  func.func @_critic_kernel(%arg0: i32, %arg1: memref<16x16xf32, #tpu.memory_space<vmem>>, %arg2: memref<16x128xbf16, #tpu.memory_space<vmem>>, %arg3: memref<1x128xf32, #tpu.memory_space<vmem>>, %arg4: memref<128x128xbf16, #tpu.memory_space<vmem>>, %arg5: memref<1x128xf32, #tpu.memory_space<vmem>>, %arg6: memref<128x128xf32, #tpu.memory_space<vmem>>, %arg7: memref<1x128xf32, #tpu.memory_space<vmem>>, %arg8: memref<16x128xf32, #tpu.memory_space<vmem>>) attributes {dimension_semantics = [#tpu.dimension_semantics<parallel>], iteration_bounds = array<i64: 1>, scalar_prefetch = 0 : i64, scratch_operands = 0 : i64, tpu.core_type = #tpu.core_type<tc>, window_params = [{transform_indices = @transform_0, window_bounds = array<i64: 16, 16>}, {pipeline_mode = #tpu.pipeline_mode<synchronous>, transform_indices = @transform_1, window_bounds = array<i64: 16, 128>}, {pipeline_mode = #tpu.pipeline_mode<synchronous>, transform_indices = @transform_2, window_bounds = array<i64: 1, 128>}, {pipeline_mode = #tpu.pipeline_mode<synchronous>, transform_indices = @transform_3, window_bounds = array<i64: 128, 128>}, {pipeline_mode = #tpu.pipeline_mode<synchronous>, transform_indices = @transform_4, window_bounds = array<i64: 1, 128>}, {pipeline_mode = #tpu.pipeline_mode<synchronous>, transform_indices = @transform_5, window_bounds = array<i64: 128, 128>}, {pipeline_mode = #tpu.pipeline_mode<synchronous>, transform_indices = @transform_6, window_bounds = array<i64: 1, 128>}, {transform_indices = @transform_7, window_bounds = array<i64: 16, 128>}]} {
    %c0 = arith.constant 0 : index
    %c0_0 = arith.constant 0 : index
    %0 = vector.load %arg1[%c0, %c0_0] : memref<16x16xf32, #tpu.memory_space<vmem>>, vector<16x16xf32>
    %1 = arith.truncf %0 : vector<16x16xf32> to vector<16x16xbf16>
    %c0_1 = arith.constant 0 : index
    %c0_2 = arith.constant 0 : index
    %2 = vector.load %arg2[%c0_1, %c0_2] : memref<16x128xbf16, #tpu.memory_space<vmem>>, vector<16x128xbf16>
    %cst = arith.constant dense<0.000000e+00> : vector<16x128xf32>
    %3 = tpu.matmul %1, %2, %cst {dimension_numbers = #tpu.dot_dimension_numbers<[1], [0], [0], [1], [0, 0, 1, 1], [], []>} : vector<16x16xbf16>, vector<16x128xbf16>, vector<16x128xf32> -> vector<16x128xf32>
    %c0_3 = arith.constant 0 : index
    %c0_4 = arith.constant 0 : index
    %4 = vector.load %arg3[%c0_3, %c0_4] : memref<1x128xf32, #tpu.memory_space<vmem>>, vector<1x128xf32>
    %5 = vector.broadcast %4 : vector<1x128xf32> to vector<16x128xf32>
    %6 = arith.addf %3, %5 : vector<16x128xf32>
    %cst_5 = arith.constant 0.000000e+00 : f32
    %7 = vector.broadcast %cst_5 : f32 to vector<16x128xf32>
    %8 = arith.maximumf %6, %7 : vector<16x128xf32>
    %9 = arith.truncf %8 : vector<16x128xf32> to vector<16x128xbf16>
    %c0_6 = arith.constant 0 : index
    %c0_7 = arith.constant 0 : index
    %10 = vector.load %arg4[%c0_6, %c0_7] : memref<128x128xbf16, #tpu.memory_space<vmem>>, vector<128x128xbf16>
    %cst_8 = arith.constant dense<0.000000e+00> : vector<16x128xf32>
    %11 = tpu.matmul %9, %10, %cst_8 {dimension_numbers = #tpu.dot_dimension_numbers<[1], [0], [0], [1], [0, 0, 1, 1], [], []>} : vector<16x128xbf16>, vector<128x128xbf16>, vector<16x128xf32> -> vector<16x128xf32>
    %c0_9 = arith.constant 0 : index
    %c0_10 = arith.constant 0 : index
    %12 = vector.load %arg5[%c0_9, %c0_10] : memref<1x128xf32, #tpu.memory_space<vmem>>, vector<1x128xf32>
    %13 = vector.broadcast %12 : vector<1x128xf32> to vector<16x128xf32>
    %14 = arith.addf %11, %13 : vector<16x128xf32>
    %cst_11 = arith.constant 0.000000e+00 : f32
    %15 = vector.broadcast %cst_11 : f32 to vector<16x128xf32>
    %16 = arith.maximumf %14, %15 : vector<16x128xf32>
    %c0_12 = arith.constant 0 : index
    %c0_13 = arith.constant 0 : index
    %17 = vector.load %arg6[%c0_12, %c0_13] : memref<128x128xf32, #tpu.memory_space<vmem>>, vector<128x128xf32>
    %cst_14 = arith.constant dense<0.000000e+00> : vector<16x128xf32>
    %18 = tpu.matmul %16, %17, %cst_14 {dimension_numbers = #tpu.dot_dimension_numbers<[1], [0], [0], [1], [0, 0, 1, 1], [], []>} : vector<16x128xf32>, vector<128x128xf32>, vector<16x128xf32> -> vector<16x128xf32>
    %c0_15 = arith.constant 0 : index
    %c0_16 = arith.constant 0 : index
    %19 = vector.load %arg7[%c0_15, %c0_16] : memref<1x128xf32, #tpu.memory_space<vmem>>, vector<1x128xf32>
    %20 = vector.broadcast %19 : vector<1x128xf32> to vector<16x128xf32>
    %21 = arith.addf %18, %20 : vector<16x128xf32>
    %c0_17 = arith.constant 0 : index
    %c0_18 = arith.constant 0 : index
    %22 = vector.load %arg8[%c0_17, %c0_18] : memref<16x128xf32, #tpu.memory_space<vmem>>, vector<16x128xf32>
    tpu.vector_store %arg8[%c0_17, %c0_18], %21 {strides = array<i32>} : memref<16x128xf32, #tpu.memory_space<vmem>>, vector<16x128xf32>,
    return
  }
  func.func @transform_0(%arg0: i32) -> (i32, i32) {
    %c0_i32 = arith.constant 0 : i32
    %c0_i32_0 = arith.constant 0 : i32
    return %arg0, %c0_i32 : i32, i32
  }
  func.func @transform_1(%arg0: i32) -> (i32, i32) {
    %c0_i32 = arith.constant 0 : i32
    %c0_i32_0 = arith.constant 0 : i32
    %c0_i32_1 = arith.constant 0 : i32
    return %c0_i32, %c0_i32_0 : i32, i32
  }
  func.func @transform_2(%arg0: i32) -> (i32, i32) {
    %c0_i32 = arith.constant 0 : i32
    %c0_i32_0 = arith.constant 0 : i32
    %c0_i32_1 = arith.constant 0 : i32
    return %c0_i32, %c0_i32_0 : i32, i32
  }
  func.func @transform_3(%arg0: i32) -> (i32, i32) {
    %c0_i32 = arith.constant 0 : i32
    %c0_i32_0 = arith.constant 0 : i32
    %c0_i32_1 = arith.constant 0 : i32
    return %c0_i32, %c0_i32_0 : i32, i32
  }
  func.func @transform_4(%arg0: i32) -> (i32, i32) {
    %c0_i32 = arith.constant 0 : i32
    %c0_i32_0 = arith.constant 0 : i32
    %c0_i32_1 = arith.constant 0 : i32
    return %c0_i32, %c0_i32_0 : i32, i32
  }
  func.func @transform_5(%arg0: i32) -> (i32, i32) {
    %c0_i32 = arith.constant 0 : i32
    %c0_i32_0 = arith.constant 0 : i32
    %c0_i32_1 = arith.constant 0 : i32
    return %c0_i32, %c0_i32_0 : i32, i32
  }
  func.func @transform_6(%arg0: i32) -> (i32, i32) {
    %c0_i32 = arith.constant 0 : i32
    %c0_i32_0 = arith.constant 0 : i32
    %c0_i32_1 = arith.constant 0 : i32
    return %c0_i32, %c0_i32_0 : i32, i32
  }
  func.func @transform_7(%arg0: i32) -> (i32, i32) {
    %c0_i32 = arith.constant 0 : i32
    %c0_i32_0 = arith.constant 0 : i32
    return %arg0, %c0_i32 : i32, i32
  }
}

</mosaic_0001>

<bundles_post_ra>
// kernel: critic_forward.1
= control target key start
LH: loop header
LB: loop body
LE: loop exit
PB: predicated region body
PF: predicated region fallthrough
CT: control target
= control target key end

     0   :  { %12 = vsyncpa [#allocation3], 0  ;;  %s637_s0 = inlined_call_operand.vmem [shape: f32[16,16], index: 0, kind: input, shape index: {}]   ;;  %s638_s1 = inlined_call_operand.vmem [shape: bf16[16,128], index: 1, kind: input, shape index: {}]   ;;  %s639_s2 = inlined_call_operand.vmem [shape: f32[1,128], index: 2, kind: input, shape index: {}]   ;;  %s640_s3 = inlined_call_operand.hbm [shape: bf16[128,128], index: 3, kind: input, shape index: {}]   ;;  %s641_s4 = inlined_call_operand.vmem [shape: f32[1,128], index: 4, kind: input, shape index: {}]   ;;  %s642_s5 = inlined_call_operand.hbm [shape: f32[128,128], index: 5, kind: input, shape index: {}]   ;;  %s643_s6 = inlined_call_operand.vmem [shape: f32[1,128], index: 6, kind: input, shape index: {}]   ;;  %s644_s7 = inlined_call_operand.vmem [shape: f32[16,128], index: 7, kind: output, shape index: {}]  }
   0x1   :  { %13 = vsyncpa [#allocation5], 0  ;;  %s541_s24 = smov [#allocation2]   ;;  %s493_s28 = scalar_lea.hbm %s640_s3, 1024 }
   0x2   :  { %s25_s25 = sshll.u32 %s541_s24, 4  ;;  %p494_p0 = scmp.ne.s32.totalorder %s640_s3, %s493_s28  ;;  %s26_s25 = int_to_ptr.vmem [resolvable:$true] %s25_s25 }
   0x3   :  { %p497_p1 = scmp.lt.u32.totalorder %s493_s28, %s640_s3 }
   0x5   :  { %p499_p2 = pnand %p497_p1, %p494_p0 }
   0x7   :  { %502 = shalt.err (!%p499_p2)
}
   0x8   :  { %s503_s10 = scalar_lea.vmem %s26_s25, 1024  ;;  %p508_p4 = scmp.lt.s32.totalorder %s26_s25, %s26_s25 }
   0x9   :  { %p504_p3 = scmp.ne.s32.totalorder %s26_s25, %s503_s10  ;;  %p509_p5 = scmp.lt.s32.totalorder %s503_s10, %s503_s10 }
   0xb   :  { %p510_p6 = por %p509_p5, %p508_p4 }
   0xd   :  { %p511_p7 = pnand %p510_p6, %p504_p3 }
   0xf   :  { %514 = shalt.err (!%p511_p7)
}
  0x10   :  { %s542_s11 = smov 64   ;;  %s543_s12 = smov 4  }
  0x11   :  { %31 = dma.hbm_to_vmem [thread:$0]  %s640_s3, 1024, %s26_s25, [#allocation3], %s542_s11, %s542_s11, %s543_s12  }
  0x12   :  { %s544_s15 = smov [#allocation4]   ;;  %s515_s19 = scalar_lea.hbm %s642_s5, 2048 }
  0x13   :  { %s39_s16 = sshll.u32 %s544_s15, 4  ;;  %p516_p8 = scmp.ne.s32.totalorder %s642_s5, %s515_s19  ;;  %s40_s16 = int_to_ptr.vmem [resolvable:$true] %s39_s16 }
  0x14   :  { %p519_p9 = scmp.lt.u32.totalorder %s515_s19, %s642_s5 }
  0x16   :  { %p521_p10 = pnand %p519_p9, %p516_p8 }
  0x18   :  { %524 = shalt.err (!%p521_p10)
}
  0x19   :  { %s525_s24 = scalar_lea.vmem %s40_s16, 2048  ;;  %p530_p12 = scmp.lt.s32.totalorder %s40_s16, %s40_s16 }
  0x1a   :  { %p526_p11 = scmp.ne.s32.totalorder %s40_s16, %s525_s24  ;;  %p531_p13 = scmp.lt.s32.totalorder %s525_s24, %s525_s24 }
  0x1c   :  { %p532_p0 = por %p531_p13, %p530_p12 }
  0x1e   :  { %p533_p1 = pnand %p532_p0, %p526_p11 }
  0x20   :  { %536 = shalt.err (!%p533_p1)
}
  0x21   :  { %s545_s3 = smov 128   ;;  %s546_s25 = smov 8  }
  0x22   :  { %45 = dma.hbm_to_vmem [thread:$0]  %s642_s5, 2048, %s40_s16, [#allocation5], %s545_s3, %s545_s3, %s546_s25  }
  0x23   :  { %537 = dma.done.wait [#allocation3], 1024  }
  0x24   :  { %538 = vsyncadd [#allocation3], 4294966272 }
  0x25   :  { %539 = dma.done.wait [#allocation5], 2048  }
  0x26   :  { %540 = vsyncadd [#allocation5], 4294965248  ;;  %v547_v0 = vmov 0.0   ;;  %vm548_vm0 = vmmov 0   ;;  %v484_v1 = vld [vmem:[%s638_s1] sm:$0xff]   ;;  %v56_v3 = vld [vmem:[%s637_s0 + $0x8] sm:$0xff] }
  0x27   :  { %383 = vmatprep.subr.bf16.mxu0 %v547_v0  ;;  %385 = vmatprep.mubr.msk.bf16.mxu0 %vm548_vm0, %v547_v0  ;;  %v55_v2 = vld [vmem:[%s637_s0] sm:$0xff]  ;;  %vm73_vm1 = vcmask 130048   ;;  %v486_v6 = vld [vmem:[#allocation2 + $0x8] sm:$0xff]   ;;  %v487_v7 = vld [vmem:[#allocation2 + $0x10] sm:$0xff]  }
  0x28   :  { %389 = vmatprep.subr.bf16.mxu1 %v547_v0  ;;  %405 = vmatprep.mubr.msk.bf16.mxu1 %vm548_vm0, %v547_v0  ;;  %v57_v4 = vpack.c.bf16 %v56_v3, %v55_v2  ;;  %v485_v5 = vld [vmem:[#allocation2] sm:$0xff]   ;;  %v488_v8 = vld [vmem:[#allocation2 + $0x18] sm:$0xff]   ;;  %v490_v10 = vld [vmem:[#allocation2 + $0x28] sm:$0xff]  }
  0x29   :  { %384 = vmatpush3.bf16.msra.mxu0 %v484_v1  ;;  %390 = vmatpush3.bf16.msra.mxu1 %v485_v5  ;;  %v489_v9 = vld [vmem:[#allocation2 + $0x20] sm:$0xff]   ;;  %v491_v11 = vld [vmem:[#allocation2 + $0x30] sm:$0xff]   ;;  %v492_v12 = vld [vmem:[#allocation2 + $0x38] sm:$0xff]  }
  0x2a   :  { %391 = vmatprep.subr.bf16.mxu1 %v547_v0  ;;  %v235_v13 = vld [vmem:[#allocation4] sm:$0xff]  ;;  %v236_v14 = vld [vmem:[#allocation4 + $0x8] sm:$0xff]  ;;  %v237_v15 = vld [vmem:[#allocation4 + $0x10] sm:$0xff] }
  0x2b   :  { %v444_v16 = vpack.c.bf16 %v236_v14, %v235_v13  ;;  %v238_v17 = vld [vmem:[#allocation4 + $0x18] sm:$0xff]  ;;  %v239_v19 = vld [vmem:[#allocation4 + $0x20] sm:$0xff]  ;;  %v240_v20 = vld [vmem:[#allocation4 + $0x28] sm:$0xff] }
  0x2c   :  { %386 = vmatmul.mubr.msk.bf16.vlgmr.msra.gmra.mrb[0].mxu0 %vm73_vm1, %v57_v4  ;;  %v448_v18 = vpack.c.bf16 %v238_v17, %v237_v15  ;;  %v452_v21 = vpack.c.bf16 %v240_v20, %v239_v19  ;;  %v241_v22 = vld [vmem:[#allocation4 + $0x30] sm:$0xff]  ;;  %v242_v23 = vld [vmem:[#allocation4 + $0x38] sm:$0xff]  ;;  %v243_v25 = vld [vmem:[#allocation4 + $0x40] sm:$0xff] }
  0x2d   :  { %392 = vmatpush3.bf16.msra.mxu1 %v486_v6  ;;  %445 = vmatprep.subr.bf16.mxu0 %v444_v16  ;;  %v456_v24 = vpack.c.bf16 %v242_v23, %v241_v22  ;;  %v244_v26 = vld [vmem:[#allocation4 + $0x48] sm:$0xff]  ;;  %v245_v28 = vld [vmem:[#allocation4 + $0x50] sm:$0xff]  ;;  %v246_v29 = vld [vmem:[#allocation4 + $0x58] sm:$0xff] }
  0x2e   :  { %393 = vmatprep.subr.bf16.mxu1 %v547_v0  ;;  %447 = vmatpush3.bf16.msra.mxu0 %v444_v16  ;;  %v460_v27 = vpack.c.bf16 %v244_v26, %v243_v25  ;;  %v464_v30 = vpack.c.bf16 %v246_v29, %v245_v28  ;;  %v247_v31 = vld [vmem:[#allocation4 + $0x60] sm:$0xff]  ;;  %v248_v32 = vld [vmem:[#allocation4 + $0x68] sm:$0xff]  ;;  %v249_v44 = vld [vmem:[#allocation4 + $0x70] sm:$0xff] }
  0x2f   :  { %449 = vmatprep.subr.bf16.mxu0 %v448_v18  ;;  %v468_v33 = vpack.c.bf16 %v248_v32, %v247_v31  ;;  %v341_v34 = vld [vmem:[%s639_s2] ss:$0 sm:$0xff]  ;;  %v250_v45 = vld [vmem:[#allocation4 + $0x78] sm:$0xff] }
  0x30   :  { %v472_v46 = vpack.c.bf16 %v250_v45, %v249_v44  ;;  %v344_v47 = vld [vmem:[%s641_s4] ss:$0 sm:$0xff] }
  0x31   :  { %394 = vmatpush3.bf16.msra.mxu1 %v487_v7  ;;  %v353_v56 = vld [vmem:[%s643_s6] ss:$0 sm:$0xff] }
  0x32   :  { %395 = vmatprep.subr.bf16.mxu1 %v547_v0  ;;  %451 = vmatpush3.bf16.msra.mxu0 %v448_v18 }
  0x33   :  { %453 = vmatprep.subr.bf16.mxu0 %v452_v21 }
  0x35   :  { %396 = vmatpush3.bf16.msra.mxu1 %v488_v8 }
  0x36   :  { %397 = vmatprep.subr.bf16.mxu1 %v547_v0  ;;  %455 = vmatpush3.bf16.msra.mxu0 %v452_v21 }
  0x37   :  { %457 = vmatprep.subr.bf16.mxu0 %v456_v24 }
  0x39   :  { %398 = vmatpush3.bf16.msra.mxu1 %v489_v9 }
  0x3a   :  { %399 = vmatprep.subr.bf16.mxu1 %v547_v0  ;;  %459 = vmatpush3.bf16.msra.mxu0 %v456_v24 }
  0x3b   :  { %461 = vmatprep.subr.bf16.mxu0 %v460_v27 }
  0x3d   :  { %400 = vmatpush3.bf16.msra.mxu1 %v490_v10 }
  0x3e   :  { %401 = vmatprep.subr.bf16.mxu1 %v547_v0  ;;  %463 = vmatpush3.bf16.msra.mxu0 %v460_v27 }
  0x3f   :  { %465 = vmatprep.subr.bf16.mxu0 %v464_v30 }
  0x41   :  { %402 = vmatpush3.bf16.msra.mxu1 %v491_v11 }
  0x42   :  { %403 = vmatprep.subr.bf16.mxu1 %v547_v0  ;;  %467 = vmatpush3.bf16.msra.mxu0 %v464_v30 }
  0x43   :  { %469 = vmatprep.subr.bf16.mxu0 %v468_v33 }
  0x45   :  { %404 = vmatpush3.bf16.msra.mxu1 %v492_v12 }
  0x46   :  { %471 = vmatpush3.bf16.msra.mxu0 %v468_v33 }
  0x47   :  { %473 = vmatprep.subr.bf16.mxu0 %v472_v46 }
  0x4a   :  { %475 = vmatpush3.bf16.msra.mxu0 %v472_v46 }
  0xff   :  { %v111_v35 = vpop.f32.mrb[0].mxu0 }
 0x100   :  { %v112_v36 = vadd.f32 %v341_v34, %v111_v35  ;;  %v387_v37 = vpop.f32.mrb[1].mxu0 }
 0x101   :  { %v114_v38 = vpop.f32.mrb[2].mxu0 }
 0x102   :  { %v115_v39 = vadd.f32 %v341_v34, %v114_v38  ;;  %v388_v40 = vpop.f32.mrb[3].mxu0  ;;  %v118_v41 = vmax.f32 %v112_v36, 0.0 }
 0x104   :  { %v119_v42 = vmax.f32 %v115_v39, 0.0 }
 0x106   :  { %v120_v43 = vpack.c.bf16 %v119_v42, %v118_v41 }
 0x108   :  { %406 = vmatmul.mubr.bf16.vlgmr.msra.gmra.mrb[0].mxu1 %v120_v43 }
 0x1db   :  { %v226_v48 = vpop.f32.mrb[0].mxu1 }
 0x1dc   :  { %v227_v49 = vadd.f32 %v344_v47, %v226_v48  ;;  %v407_v50 = vpop.f32.mrb[1].mxu1 }
 0x1dd   :  { %v229_v51 = vpop.f32.mrb[2].mxu1 }
 0x1de   :  { %v233_v52 = vmax.f32 %v227_v49, 0.0  ;;  %v230_v53 = vadd.f32 %v344_v47, %v229_v51  ;;  %v408_v54 = vpop.f32.mrb[3].mxu1 }
 0x1e0   :  { %v234_v55 = vmax.f32 %v230_v53, 0.0  ;;  %441 = vmatprep.mubr.f32.mxu0 %v233_v52 }
 0x1e2   :  { %442 = vmatmul.mubr.f32.vlgmr.msra.gmra.mrb[4].mxu0 %v234_v55 }
 0x2b5   :  { %v443_v57 = vpop.f32.mrb[4].mxu0 }
 0x2b6   :  { %v330_v58 = vadd.f32 %v443_v57, %v353_v56  ;;  %v324_v59 = vpop.f32.mrb[5].mxu0 }
 0x2b7   :  { %v325_v60 = vadd.f32 %v353_v56, %v324_v59 }
 0x2b8   :  { %334 = vst [vmem:[%s644_s7 + $0x8] sm:$0xff] %v330_v58 }
 0x2b9   :  { %333 = vst [vmem:[%s644_s7] sm:$0xff] %v325_v60 }
 0x2ba   :  { %339 = vsyncpa [#allocation3], 1 }
 0x2bb   :  { %340 = vsyncpa [#allocation5], 1 }

</bundles_post_ra>
